<compile_context>
chip_gen: v7x
topology: tpu7x:2x2x1
jax: 0.10.0
libtpu: 0.0.40
codegen_flags: <defaults>
</compile_context>

<pallas_src>
import jax
import jax.numpy as jnp
from jax import lax
from jax.experimental import pallas as pl
from jax.experimental.pallas import tpu as pltpu

IN_FEATURES = 196608          # = 3 * 256 * 256
OUT_FEATURES = 10
TK = 65536                    # reduction tile: 196608 / 65536 = 3 grid steps
CHUNK = 512                   # inner lane-chunk for the VPU contraction


def linear_kernel(x_ref, w_ref, b_ref, o_ref, acc_ref):
    """One reduction step over a TK-wide slice of K.

    x_ref  : (B, TK)            activations tile
    w_ref  : (O, TK)            weight tile, native (out, in) layout
    b_ref  : (1, O)             bias (resident across the grid)
    o_ref  : (B, O)             output (resident; written on the last step)
    acc_ref: (B, O, CHUNK) f32  per-lane partial sums (resident scratch)

    VPU contraction: for each CHUNK of lanes, acc[b,o,l] += x[b,l] * w[o,l].
    The cross-lane reduction to (B, O) happens once, on the final grid step.
    """
    k = pl.program_id(0)

    @pl.when(k == 0)
    def _():
        acc_ref[...] = jnp.zeros_like(acc_ref)

    n_chunks = x_ref.shape[-1] // CHUNK

    def body(c, acc):
        off = pl.multiple_of(c * CHUNK, CHUNK)
        xc = x_ref[:, pl.ds(off, CHUNK)]              # (B, CHUNK)
        wc = w_ref[:, pl.ds(off, CHUNK)]              # (O, CHUNK)
        prod = jnp.expand_dims(xc, 1) * jnp.expand_dims(wc, 0)  # (B, O, CHUNK)
        return acc + prod

    acc = lax.fori_loop(0, n_chunks, body, acc_ref[...])
    acc_ref[...] = acc

    @pl.when(k == pl.num_programs(0) - 1)
    def _():
        out = jnp.sum(acc, axis=-1) + b_ref[...]      # (B, O) + (1, O)
        o_ref[...] = out.astype(o_ref.dtype)


def prepare_linear_params(weight, bias):
    """One-time layout prep (parameter init, NOT the per-call path):
    keep W in its native (out_features, in_features) layout so the dominant
    HBM weight stream is lane-contiguous; only reshape bias to (1, out)."""
    return weight, bias.reshape(1, OUT_FEATURES)


def pallas_linear(x, w, b2d):
    """x: (B, K) f32, w: (O, K) f32 (native layout), b2d: (1, O) f32 -> (B, O)."""
    B, K = x.shape
    O, Kw = w.shape
    assert Kw == K and K % TK == 0 and TK % CHUNK == 0

    grid = (K // TK,)
    return pl.pallas_call(
        linear_kernel,
        out_shape=jax.ShapeDtypeStruct((B, O), jnp.float32),
        grid_spec=pltpu.PrefetchScalarGridSpec(
            num_scalar_prefetch=0,
            grid=grid,
            in_specs=[
                pl.BlockSpec((B, TK), lambda k: (0, k)),   # x tile
                pl.BlockSpec((O, TK), lambda k: (0, k)),   # W tile, native layout
                pl.BlockSpec((1, O), lambda k: (0, 0)),    # bias (resident)
            ],
            out_specs=pl.BlockSpec((B, O), lambda k: (0, 0)),  # resident output
            scratch_shapes=[pltpu.VMEM((B, O, CHUNK), jnp.float32)],
        ),
        compiler_params=pltpu.CompilerParams(
            dimension_semantics=("arbitrary",),   # K is a reduction axis
            vmem_limit_bytes=32 * 1024 * 1024,    # ~12 MiB actually used
        ),
    )(x, w, b2d)


if __name__ == "__main__":
    key = jax.random.PRNGKey(0)
    kx, kw, kb = jax.random.split(key, 3)

    batch = 2
    x = jax.random.normal(kx, (batch, IN_FEATURES), dtype=jnp.float32)

    # Deterministic parameter init mimicking nn.Linear default:
    # U(-1/sqrt(in_features), 1/sqrt(in_features))
    bound = 1.0 / (IN_FEATURES ** 0.5)
    weight = jax.random.uniform(
        kw, (OUT_FEATURES, IN_FEATURES), minval=-bound, maxval=bound, dtype=jnp.float32
    )
    bias = jax.random.uniform(
        kb, (OUT_FEATURES,), minval=-bound, maxval=bound, dtype=jnp.float32
    )

    # One-time parameter layout prep (outside the per-call path).
    w_prep, b2d = prepare_linear_params(weight, bias)
    w_prep, b2d = jax.block_until_ready((w_prep, b2d))

    y = pallas_linear(x, w_prep, b2d)
    y = jax.block_until_ready(y)

    # Correctness check against plain-JAX reference.
    y_ref = x @ weight.T + bias
    assert y.shape == (batch, OUT_FEATURES)
    assert jnp.allclose(y, y_ref, atol=1e-3, rtol=1e-3), "mismatch vs reference"

    print("KERNEL_OK")
</pallas_src>

<mosaic_0001>
module attributes {stable_mosaic.version = 11 : i64} {
  func.func @linear_kernel(%arg0: i32, %arg1: memref<2x65536xf32, #tpu.memory_space<vmem>>, %arg2: memref<10x65536xf32, #tpu.memory_space<vmem>>, %arg3: memref<1x10xf32, #tpu.memory_space<vmem>>, %arg4: memref<2x10xf32, #tpu.memory_space<vmem>>, %arg5: memref<2x10x512xf32, #tpu.memory_space<vmem>>) attributes {dimension_semantics = [#tpu.dimension_semantics<arbitrary>], iteration_bounds = array<i64: 3>, scalar_prefetch = 0 : i64, scratch_operands = 1 : i64, tpu.core_type = #tpu.core_type<tc>, window_params = [{transform_indices = @transform_0, window_bounds = array<i64: 2, 65536>}, {transform_indices = @transform_1, window_bounds = array<i64: 10, 65536>}, {pipeline_mode = #tpu.pipeline_mode<synchronous>, transform_indices = @transform_2, window_bounds = array<i64: 1, 10>}, {pipeline_mode = #tpu.pipeline_mode<synchronous>, transform_indices = @transform_3, window_bounds = array<i64: 2, 10>}]} {
    %c0_i32 = arith.constant 0 : i32
    %0 = arith.cmpi eq, %arg0, %c0_i32 : i32
    %1 = arith.extui %0 : i1 to i32
    %c0_i32_0 = arith.constant 0 : i32
    %2 = arith.cmpi ne, %1, %c0_i32_0 : i32
    scf.if %2 {
      %cst = arith.constant 0.000000e+00 : f32
      %10 = vector.broadcast %cst : f32 to vector<2x10x512xf32>
      %c0_9 = arith.constant 0 : index
      %c0_10 = arith.constant 0 : index
      %c0_11 = arith.constant 0 : index
      %11 = vector.load %arg5[%c0_9, %c0_10, %c0_11] : memref<2x10x512xf32, #tpu.memory_space<vmem>>, vector<2x10x512xf32>
      tpu.vector_store %arg5[%c0_9, %c0_10, %c0_11], %10 {strides = array<i32>} : memref<2x10x512xf32, #tpu.memory_space<vmem>>, vector<2x10x512xf32>,
    } else {
    }
    %c0 = arith.constant 0 : index
    %c0_1 = arith.constant 0 : index
    %c0_2 = arith.constant 0 : index
    %3 = vector.load %arg5[%c0, %c0_1, %c0_2] : memref<2x10x512xf32, #tpu.memory_space<vmem>>, vector<2x10x512xf32>
    %c0_i32_3 = arith.constant 0 : i32
    %c128_i32 = arith.constant 128 : i32
    %4 = arith.addi %c0_i32_3, %c128_i32 : i32
    %c1_i32 = arith.constant 1 : i32
    %5 = scf.for %arg6 = %c0_i32_3 to %4 step %c1_i32 iter_args(%arg7 = %3) -> (vector<2x10x512xf32>)  : i32 {
      %c512_i32 = arith.constant 512 : i32
      %10 = arith.muli %arg6, %c512_i32 : i32
      %11 = tpu.assume_multiple %10, 512 : i32
      %c0_9 = arith.constant 0 : index
      %12 = arith.index_cast %11 : i32 to index
      %13 = vector.load %arg1[%c0_9, %12] : memref<2x65536xf32, #tpu.memory_space<vmem>>, vector<2x512xf32>
      %c0_10 = arith.constant 0 : index
      %14 = arith.index_cast %11 : i32 to index
      %15 = vector.load %arg2[%c0_10, %14] : memref<10x65536xf32, #tpu.memory_space<vmem>>, vector<10x512xf32>
      %16 = vector.shape_cast %13 : vector<2x512xf32> to vector<2x1x512xf32>
      %17 = vector.shape_cast %15 : vector<10x512xf32> to vector<1x10x512xf32>
      %18 = vector.broadcast %16 : vector<2x1x512xf32> to vector<2x10x512xf32>
      %19 = vector.broadcast %17 : vector<1x10x512xf32> to vector<2x10x512xf32>
      %20 = arith.mulf %18, %19 : vector<2x10x512xf32>
      %21 = arith.addf %arg7, %20 : vector<2x10x512xf32>
      scf.yield %21 : vector<2x10x512xf32>
    }
    %c128_i32_4 = arith.constant 128 : i32
    %c0_5 = arith.constant 0 : index
    %c0_6 = arith.constant 0 : index
    %c0_7 = arith.constant 0 : index
    %6 = vector.load %arg5[%c0_5, %c0_6, %c0_7] : memref<2x10x512xf32, #tpu.memory_space<vmem>>, vector<2x10x512xf32>
    tpu.vector_store %arg5[%c0_5, %c0_6, %c0_7], %5 {strides = array<i32>} : memref<2x10x512xf32, #tpu.memory_space<vmem>>, vector<2x10x512xf32>,
    %c2_i32 = arith.constant 2 : i32
    %7 = arith.cmpi eq, %arg0, %c2_i32 : i32
    %8 = arith.extui %7 : i1 to i32
    %c0_i32_8 = arith.constant 0 : i32
    %9 = arith.cmpi ne, %8, %c0_i32_8 : i32
    scf.if %9 {
      %cst = arith.constant dense<0.000000e+00> : vector<2x10xf32>
      %10 = vector.multi_reduction <add>, %5, %cst [2] : vector<2x10x512xf32> to vector<2x10xf32>
      %c0_9 = arith.constant 0 : index
      %c0_10 = arith.constant 0 : index
      %11 = vector.load %arg3[%c0_9, %c0_10] : memref<1x10xf32, #tpu.memory_space<vmem>>, vector<1x10xf32>
      %12 = vector.broadcast %11 : vector<1x10xf32> to vector<2x10xf32>
      %13 = arith.addf %10, %12 : vector<2x10xf32>
      %c0_11 = arith.constant 0 : index
      %c0_12 = arith.constant 0 : index
      %14 = vector.load %arg4[%c0_11, %c0_12] : memref<2x10xf32, #tpu.memory_space<vmem>>, vector<2x10xf32>
      tpu.vector_store %arg4[%c0_11, %c0_12], %13 {strides = array<i32>} : memref<2x10xf32, #tpu.memory_space<vmem>>, vector<2x10xf32>,
    } else {
    }
    return
  }
  func.func @transform_0(%arg0: i32) -> (i32, i32) {
    %c0_i32 = arith.constant 0 : i32
    %c0_i32_0 = arith.constant 0 : i32
    return %c0_i32, %arg0 : i32, i32
  }
  func.func @transform_1(%arg0: i32) -> (i32, i32) {
    %c0_i32 = arith.constant 0 : i32
    %c0_i32_0 = arith.constant 0 : i32
    return %c0_i32, %arg0 : i32, i32
  }
  func.func @transform_2(%arg0: i32) -> (i32, i32) {
    %c0_i32 = arith.constant 0 : i32
    %c0_i32_0 = arith.constant 0 : i32
    %c0_i32_1 = arith.constant 0 : i32
    return %c0_i32, %c0_i32_0 : i32, i32
  }
  func.func @transform_3(%arg0: i32) -> (i32, i32) {
    %c0_i32 = arith.constant 0 : i32
    %c0_i32_0 = arith.constant 0 : i32
    %c0_i32_1 = arith.constant 0 : i32
    return %c0_i32, %c0_i32_0 : i32, i32
  }
}

</mosaic_0001>

<bundles_post_ra>
// kernel: tpu_custom_call.1
= control target key start
LH: loop header
LB: loop body
LE: loop exit
PB: predicated region body
PF: predicated region fallthrough
CT: control target
= control target key end

     0   :  { %8 = vsyncpa [#allocation4], 0  ;;  %s1566_s0 = inlined_call_operand.hbm [shape: f32[2,196608], index: 0, kind: input, shape index: {}]   ;;  %s1567_s1 = inlined_call_operand.hbm [shape: f32[10,196608], index: 1, kind: input, shape index: {}]   ;;  %s1568_s2 = inlined_call_operand.hbm [shape: f32[1,10], index: 2, kind: input, shape index: {}]   ;;  %s1569_s3 = inlined_call_operand.hbm [shape: f32[2,10], index: 3, kind: output, shape index: {}]  }
   0x1   :  { %10 = vsyncpa [#allocation4 + $0x1], 0 }
   0x2   :  { %11 = vsyncpa [#allocation7], 0 }
   0x3   :  { %13 = vsyncpa [#allocation7 + $0x1], 0 }
   0x4   :  { %14 = vsyncpa [#allocation5], 0  ;;  %s1200_s12 = smov 0   ;;  %s1202_s13 = smov 0  }
   0x5   :  { %s1204_s14 = smov 0   ;;  %s1206_s15 = smov 0  }
   0x6 LB: > { %s1219_s16 = sadd.s32 4294967295, %s1101_s15   ;;  %s1222_s17 = sadd.s32 1, %s1101_s15   ;;  %s1101_s15 = sphi %s1206_s15, %s1607_s15   ;;  %s1097_s14 = sphi %s1204_s14, %s1606_s14   ;;  %s1093_s13 = sphi %s1202_s13, %s1605_s13   ;;  %s1089_s12 = sphi %s1200_s12, %s1604_s12  }
   0x7   : > { %s24_s18 = ssub.s32 %s1101_s15, %s1222_s17  ;;  %s27_s19 = sadd.s32 1, %s1097_s14 }
   0x8   : > { %p25_p0 = scmp.eq.s32.totalorder %s24_s18, 0  ;;  %p34_p1 = scmp.ne.s32.totalorder %s1097_s14, %s1093_s13 }
   0x9   : > { %p40_p2 = scmp.ne.s32.totalorder %s1093_s13, %s1089_s12  ;;  %p1570_p3 = scmp.eq.s32.totalorder %s1219_s16, 0 }
   0xa   : > { %s1232_s20 = scalar_select %p25_p0, %s1097_s14, %s27_s19  }
   0xb   : > { %p1236_p4 = por %p1570_p3, %p40_p2  ;;  %p642_p5 = scmp.ge.s32.totalorder %s1101_s15, 1 }
   0xc   : > { %p119_p6 = scmp.lt.s32.totalorder %s1101_s15, 4  ;;  %s1171_s23 = smov [#allocation8]  }
   0xd   : > { %s1573_s21 = scalar_select %p1236_p4, 1, 0 }
   0xe   : > { %p1243_p8 = pnand %p642_p5, %p119_p6  ;;  %s132_s24 = sshll.u32 %s1171_s23, 4  ;;  %s133_s24 = int_to_ptr.vmem [resolvable:$true] %s132_s24 }
   0xf   : > { %p35_p9 = scmp.eq.s32.totalorder %s1101_s15, 0  ;;  %s1259_s26 = sand.u32 1, %s1097_s14  }
  0x10   : > { %s1574_s22 = scalar_select %p1243_p8, 1, 0 }
  0x11   : > { %p680_p10 = pneg %p1243_p8  ;;  %p1254_p12 = por %p35_p9, %p34_p1 }
  0x12   : > { %s645_s28 = sshll.u32 %s1259_s26, 10  ;;  %s666_s29 = sshll.u32 %s1101_s15, 14 }
  0x13   : > { %s1575_s25 = scalar_select %p1254_p12, 1, 0 }
  0x14   : > { %p1263_p13 = pnand %p680_p10, %p1570_p3  ;;  %s873_s5 = scalar_lea.hbm %s1568_s2, 16 }
  0x15   : > { %p874_p0 = scmp.ne.s32.totalorder %s1568_s2, %s873_s5  ;;  %p880_p6 = scmp.lt.u32.totalorder %s873_s5, %s1568_s2 }
  0x16   : > { %p875_p1 = pneg %p1263_p13 }
  0x18   : > { %p876_p2 = pnand %p875_p1, %p874_p0 }
  0x1a   : > { %p877_p5 = pneg %p876_p2 }
  0x1c   : > { %p882_p9 = pnand %p880_p6, %p877_p5 }
  0x1e   : > { %885 = shalt.err (!%p882_p9)
}
  0x1f   : > { %s886_s10 = scalar_lea.vmem %s133_s24, 16  ;;  %s893_s11 = scalar_lea.vmem %s133_s24, 32 }
  0x20   : > { %p887_p10 = scmp.ne.s32.totalorder %s133_s24, %s886_s10  ;;  %p894_p11 = scmp.lt.s32.totalorder %s133_s24, %s133_s24 }
  0x21   : > { %p895_p4 = scmp.lt.s32.totalorder %s893_s11, %s886_s10 }
  0x22   : > { %p889_p7 = pnand %p887_p10, %p875_p1 }
  0x23   : > { %p896_p8 = por %p895_p4, %p894_p11 }
  0x24   : > { %p890_p3 = pneg %p889_p7 }
  0x26   : > { %p897_p12 = pnand %p896_p8, %p890_p3 }
  0x28   : > { %900 = shalt.err (!%p897_p12)
}
  0x29   : > { %683 = dma.hbm_to_vmem [thread:$0]  (!%p1263_p13), %s1568_s2, 16, %s133_s24, [#allocation7]  }
  0x2a   : > { %s1288_s30 = scalar_lea.hbm %s1566_s0, %s666_s29  ;;  %s147_s4 = scalar_lea.vmem [#allocation3], %s645_s28 }
  0x2b   : > { %s155_s27 = sshll.u32 %s147_s4, 4  ;;  %p1577_p3 = scmp.ne.s32.totalorder %s1575_s25, 0  ;;  %s1290_s27 = int_to_ptr.vmem [resolvable:$true] %s155_s27 }
  0x2c   : > { %p1578_p4 = scmp.lt.s32.totalorder %s1101_s15, 3  ;;  %s648_s24 = sshll.u32 %s1259_s26, 13 }
  0x2d   : > { %s162_s6 = sand.u32 1, %s1101_s15   ;;  %s144_s29 = scalar_lea.sflag [#allocation4], %s1259_s26 }
  0x2e   : > { %p1296_p7 = pnand %p1578_p4, %p1577_p3  ;;  %s901_s7 = scalar_lea.hbm %s1288_s30, 16384 }
  0x2f   : > { %p902_p8 = scmp.ne.s32.totalorder %s1288_s30, %s901_s7  ;;  %s906_s8 = scalar_lea.hbm %s1566_s0, 49152 }
  0x30   : > { %p903_p11 = pneg %p1296_p7  ;;  %p907_p0 = scmp.lt.u32.totalorder %s1288_s30, %s1566_s0 }
  0x31   : > { %p908_p1 = scmp.lt.u32.totalorder %s906_s8, %s901_s7  ;;  %p910_p5 = scmp.lt.u32.totalorder %s901_s7, %s1288_s30 }
  0x32   : > { %p904_p12 = pnand %p903_p11, %p902_p8 }
  0x33   : > { %p909_p2 = por %p908_p1, %p907_p0 }
  0x34   : > { %p905_p13 = pneg %p904_p12 }
  0x35   : > { %p911_p6 = por %p910_p5, %p909_p2 }
  0x37   : > { %p912_p9 = pnand %p911_p6, %p905_p13 }
  0x39   : > { %915 = shalt.err (!%p912_p9)
}
  0x3a   : > { %s916_s11 = scalar_lea.vmem %s1290_s27, 16384  ;;  %s1172_s12 = smov [#allocation3]  }
  0x3b   : > { %p917_p10 = scmp.ne.s32.totalorder %s1290_s27, %s916_s11  ;;  %s921_s18 = sshll.u32 %s1172_s12, 4  ;;  %s922_s18 = int_to_ptr.vmem [resolvable:$false] %s921_s18 }
  0x3c   : > { %s923_s19 = scalar_lea.vmem %s922_s18, 32768  ;;  %p924_p8 = scmp.lt.s32.totalorder %s1290_s27, %s922_s18 }
  0x3d   : > { %p919_p3 = pnand %p917_p10, %p903_p11  ;;  %p925_p12 = scmp.lt.s32.totalorder %s923_s19, %s916_s11 }
  0x3f   : > { %p920_p4 = pneg %p919_p3  ;;  %p926_p0 = por %p925_p12, %p924_p8 }
  0x41   : > { %p927_p1 = pnand %p926_p0, %p920_p4 }
  0x43   : > { %930 = shalt.err (!%p927_p1)
}
  0x44   : > { %687 = dma.hbm_to_vmem [thread:$0]  (!%p1296_p7), %s1288_s30, 16384, %s1290_s27, %s144_s29  }
  0x45   : > { %s166_s23 = scalar_lea.vmem [#allocation6], %s648_s24  ;;  %s667_s7 = sshll.u32 %s1101_s15, 16 }
  0x46   : > { %s173_s4 = sshll.u32 %s166_s23, 4  ;;  %s1336_s8 = scalar_lea.hbm %s1567_s1, %s667_s7  ;;  %s1330_s4 = int_to_ptr.vmem [resolvable:$true] %s173_s4 }
  0x47   : > { %s1340_s9 = scalar_lea.sflag [#allocation7], %s162_s6  ;;  %s931_s10 = scalar_lea.hbm %s1336_s8, 131072 }
  0x48   : > { %p932_p13 = scmp.ne.s32.totalorder %s1336_s8, %s931_s10  ;;  %s936_s27 = scalar_lea.hbm %s1567_s1, 393216 }
  0x49   : > { %p937_p6 = scmp.lt.u32.totalorder %s1336_s8, %s1567_s1  ;;  %p938_p9 = scmp.lt.u32.totalorder %s936_s27, %s931_s10 }
  0x4a   : > { %p934_p2 = pnand %p932_p13, %p903_p11  ;;  %p940_p3 = scmp.lt.u32.totalorder %s931_s10, %s1336_s8 }
  0x4b   : > { %p939_p10 = por %p938_p9, %p937_p6 }
  0x4c   : > { %p935_p5 = pneg %p934_p2 }
  0x4d   : > { %p941_p4 = por %p940_p3, %p939_p10 }
  0x4f   : > { %p942_p8 = pnand %p941_p4, %p935_p5 }
  0x51   : > { %945 = shalt.err (!%p942_p8)
}
  0x52   : > { %s946_s15 = scalar_lea.vmem %s1330_s4, 131072  ;;  %s1173_s6 = smov [#allocation6]  }
  0x53   : > { %p947_p12 = scmp.ne.s32.totalorder %s1330_s4, %s946_s15  ;;  %s951_s11 = sshll.u32 %s1173_s6, 4  ;;  %s952_s11 = int_to_ptr.vmem [resolvable:$false] %s951_s11 }
  0x54   : > { %s953_s12 = scalar_lea.vmem %s952_s11, 262144  ;;  %p954_p13 = scmp.lt.s32.totalorder %s1330_s4, %s952_s11 }
  0x55   : > { %p949_p0 = pnand %p947_p12, %p903_p11  ;;  %p955_p2 = scmp.lt.s32.totalorder %s953_s12, %s946_s15 }
  0x57   : > { %p950_p1 = pneg %p949_p0  ;;  %p956_p6 = por %p955_p2, %p954_p13 }
  0x59   : > { %p957_p9 = pnand %p956_p6, %p950_p1 }
  0x5b   : > { %960 = shalt.err (!%p957_p9)
}
  0x5c   : > { %s1174_s18 = smov 196608   ;;  %s1175_s19 = smov 65536  }
  0x5d   : > { %s1176_s23 = smov 4096   ;;  %p1580_p11 = scmp.ne.s32.totalorder %s1574_s22, 0 }
  0x5e   : > { %690 = dma.hbm_to_vmem [thread:$0]  (!%p1296_p7), %s1336_s8, 131072, %s1330_s4, %s1340_s9, %s1174_s18, %s1175_s19, %s1176_s23  }
  0x5f   : > { %185 = sbr.rel (%p1580_p11) target bundleno = 472 (0x1d8), region = 32  ;;  %s187_s7 = sand.u32 (!%p1580_p11), 1, %s1093_s13  }
  0x60   : > { %s652_s28 = sshll.u32 (!%p1580_p11), %s187_s7, 10  ;;  %s188_s25 = scalar_lea.sflag (!%p1580_p11), [#allocation4], %s187_s7 }
  0x61   : > { %s1369_s10 = scalar_lea.vmem (!%p1580_p11), [#allocation3], %s652_s28  ;;  %p1581_p5 = scmp.ne.s32.totalorder (!%p1580_p11), %s1573_s21, 0 }
  0x66   : > { %1072 = dma.done.wait (%p1581_p5), %s188_s25, 16384  }
  0x67   : > { %1074 = vsyncadd (%p1581_p5), %s188_s25, 4294950912  ;;  %s196_s26 = sand.u32 1, %s1219_s16   ;;  %s653_s5 = sshll.u32 %s187_s7, 13 }
  0x68   : > { %s197_s4 = scalar_lea.sflag [#allocation7], %s196_s26  ;;  %s1376_s8 = scalar_lea.vmem [#allocation6], %s653_s5 }
  0x69   : > { %1076 = dma.done.wait (%p1581_p5), %s197_s4, 131072  }
  0x6a   : > { %1078 = vsyncadd (%p1581_p5), %s197_s4, 4294836224  ;;  %p1582_p7 = scmp.eq.s32.totalorder %s1219_s16, 0 }
  0x6c   : > { %1080 = dma.done.wait (%p1582_p7), [#allocation7], 16   ;;  %p1583_p10 = pmov %p1582_p7 }
  0x6d   : > { %p1584_p3 = scmp.ne.s32.totalorder %s1219_s16, 0 }
  0x6e   : > { %1082 = vsyncadd (%p1583_p10), [#allocation7], 4294967280  ;;  %v1177_v0 = vmov (!%p1584_p3), 0.0  }
  0x6f   : > { %232 = sbr.rel (%p1584_p3) target bundleno = 119 (0x77), region = 48  ;;  %233 = vst [vmem:[#allocation2] sm:$0xff] (!%p1584_p3), %v1177_v0  ;;  %234 = vst [vmem:[#allocation2 + $0x8] sm:$0xff] (!%p1584_p3), %v1177_v0 }
  0x70   : > { %235 = vst [vmem:[#allocation2 + $0x10] sm:$0xff] (!%p1584_p3), %v1177_v0  ;;  %236 = vst [vmem:[#allocation2 + $0x18] sm:$0xff] (!%p1584_p3), %v1177_v0 }
  0x71   : > { %237 = vst [vmem:[#allocation2 + $0x20] sm:$0x3] (!%p1584_p3), %v1177_v0  ;;  %238 = vst [vmem:[#allocation2 + $0x28] sm:$0x3] (!%p1584_p3), %v1177_v0 }
  0x72   : > { %239 = vst [vmem:[#allocation2 + $0x30] sm:$0x3] (!%p1584_p3), %v1177_v0  ;;  %240 = vst [vmem:[#allocation2 + $0x38] sm:$0x3] (!%p1584_p3), %v1177_v0 }
  0x73   : > { %241 = vst [vmem:[#allocation2 + $0x40] sm:$0xff] (!%p1584_p3), %v1177_v0  ;;  %242 = vst [vmem:[#allocation2 + $0x48] sm:$0xff] (!%p1584_p3), %v1177_v0 }
  0x74   : > { %243 = vst [vmem:[#allocation2 + $0x50] sm:$0xff] (!%p1584_p3), %v1177_v0  ;;  %244 = vst [vmem:[#allocation2 + $0x58] sm:$0xff] (!%p1584_p3), %v1177_v0 }
  0x75   : > { %245 = vst [vmem:[#allocation2 + $0x60] sm:$0x3] (!%p1584_p3), %v1177_v0  ;;  %246 = vst [vmem:[#allocation2 + $0x68] sm:$0x3] (!%p1584_p3), %v1177_v0 }
  0x76   : > { %247 = vst [vmem:[#allocation2 + $0x70] sm:$0x3] %v1177_v0  ;;  %248 = vst [vmem:[#allocation2 + $0x78] sm:$0x3] %v1177_v0 }
  0x77 PF: > { %v249_v1 = vld [vmem:[#allocation2] sm:$0xff]   ;;  %v250_v2 = vld [vmem:[#allocation2 + $0x8] sm:$0xff]   ;;  %s1420_s21 = smov 0  }
  0x78   : > { %v251_v3 = vld [vmem:[#allocation2 + $0x10] sm:$0xff]   ;;  %v252_v4 = vld [vmem:[#allocation2 + $0x18] sm:$0xff]  }
  0x79   : > { %v253_v5 = vld [vmem:[#allocation2 + $0x20] sm:$0x3]   ;;  %v254_v6 = vld [vmem:[#allocation2 + $0x28] sm:$0x3]  }
  0x7a   : > { %v255_v7 = vld [vmem:[#allocation2 + $0x30] sm:$0x3]   ;;  %v256_v8 = vld [vmem:[#allocation2 + $0x38] sm:$0x3]  }
  0x7b   : > { %v257_v9 = vld [vmem:[#allocation2 + $0x40] sm:$0xff]   ;;  %v258_v10 = vld [vmem:[#allocation2 + $0x48] sm:$0xff]  }
  0x7c   : > { %v259_v11 = vld [vmem:[#allocation2 + $0x50] sm:$0xff]   ;;  %v260_v12 = vld [vmem:[#allocation2 + $0x58] sm:$0xff]  }
  0x7d   : > { %v261_v13 = vld [vmem:[#allocation2 + $0x60] sm:$0x3]   ;;  %v262_v14 = vld [vmem:[#allocation2 + $0x68] sm:$0x3]   ;;  %v263_v15 = vld [vmem:[#allocation2 + $0x70] sm:$0x3]  }
  0x7e   : > { %v264_v16 = vld [vmem:[#allocation2 + $0x78] sm:$0x3]  }
  0x7f LB: >> { %s656_s22 = sshll.u32 %s1169_s21, 9  ;;  %v312_v18 = vlaneseq  ;;  %s270_s21 = sadd.s32 1, %s1169_s21   ;;  %s1169_s21 = sphi %s1420_s21, %s270_s21   ;;  %v1165_v1 = vphi %v249_v1, %v1603_v1   ;;  %v1161_v2 = vphi %v250_v2, %v1602_v2   ;;  %v1157_v3 = vphi %v251_v3, %v1601_v3   ;;  %v1153_v4 = vphi %v252_v4, %v1600_v4   ;;  %v1149_v5 = vphi %v253_v5, %v1599_v5   ;;  %v1145_v6 = vphi %v254_v6, %v1598_v6   ;;  %v1141_v7 = vphi %v255_v7, %v1597_v7   ;;  %v1137_v8 = vphi %v256_v8, %v1596_v8   ;;  %v1133_v9 = vphi %v257_v9, %v1595_v9   ;;  %v1129_v10 = vphi %v258_v10, %v1594_v10   ;;  %v1125_v11 = vphi %v259_v11, %v1593_v11   ;;  %v1121_v12 = vphi %v260_v12, %v1592_v12   ;;  %v1117_v13 = vphi %v261_v13, %v1591_v13   ;;  %v1113_v14 = vphi %v262_v14, %v1590_v14   ;;  %v1109_v15 = vphi %v263_v15, %v1589_v15   ;;  %v1105_v16 = vphi %v264_v16, %v1588_v16  }
  0x80   : >> { %s288_s9 = sshra.s32 %s656_s22, 7  ;;  %p1480_p4 = scmp.ge.s32.totalorder %s270_s21, 128  }
  0x81   : >> { %s657_s30 = sshll.u32 %s288_s9, 1  ;;  %s658_s24 = sshll.u32 %s288_s9, 3  ;;  %v1461_v19 = vshrl.u32 %v312_v18, 7 }
  0x82   : >> { %s291_s27 = scalar_lea.vmem %s1369_s10, %s657_s30 [#allocation3]  ;;  %s294_s29 = scalar_lea.vmem %s1376_s8, %s658_s24 [#allocation6] }
  0x83   : >> { %v659_v17 = vld.sshfl [vmem:[%s291_s27] sm:$0xff pattern:$0x75316420]  ;;  %v296_v22 = vld [vmem:[%s294_s29 + $0x8] sm:$0xff]  ;;  %v314_v23 = vsub.s32 0, %v1461_v19  ;;  %v318_v24 = vsub.s32 1, %v1461_v19 }
  0x84   : >> { %v311_v20 = vcombine.high %v659_v17, %v659_v17  ;;  %v295_v21 = vld [vmem:[%s294_s29] sm:$0xff]  ;;  %v322_v25 = vsub.s32 2, %v1461_v19  ;;  %v326_v26 = vsub.s32 3, %v1461_v19  ;;  %v297_v27 = vld [vmem:[%s294_s29 + $0x10] sm:$0xff]  ;;  %v298_v28 = vld [vmem:[%s294_s29 + $0x18] sm:$0xff]  ;;  %p660_p8 = scmp.ne.s32.totalorder (%p1480_p4), %s1219_s16, 2 }
  0x85   : >> { %v299_v29 = vld [vmem:[%s294_s29 + $0x1000] sm:$0x3]  ;;  %v300_v30 = vld [vmem:[%s294_s29 + $0x1008] sm:$0x3]  ;;  %v301_v31 = vld [vmem:[%s294_s29 + $0x1010] sm:$0x3]  ;;  %v315_v33 = vrot.slane %v659_v17, %v314_v23  ;;  %v319_v34 = vrot.slane %v659_v17, %v318_v24 }
  0x86   : >> { %v302_v32 = vld [vmem:[%s294_s29 + $0x1018] sm:$0x3]  ;;  %v323_v35 = vrot.slane %v659_v17, %v322_v25  ;;  %v327_v36 = vrot.slane %v659_v17, %v326_v26  ;;  %v331_v37 = vrot.slane %v311_v20, %v314_v23  ;;  %v335_v38 = vrot.slane %v311_v20, %v318_v24 }
  0x87   : >> { %v339_v39 = vrot.slane %v311_v20, %v322_v25  ;;  %v343_v40 = vrot.slane %v311_v20, %v326_v26  ;;  %v352_v41 = vmul.f32 %v315_v33, %v295_v21  ;;  %v353_v42 = vmul.f32 %v319_v34, %v296_v22 }
  0x88   : >> { %v354_v43 = vmul.f32 %v323_v35, %v297_v27  ;;  %v355_v44 = vmul.f32 %v327_v36, %v298_v28  ;;  %v356_v45 = vmul.f32 %v315_v33, %v299_v29  ;;  %v357_v46 = vmul.f32 %v319_v34, %v300_v30 }
  0x89   : >> { %v358_v47 = vmul.f32 %v323_v35, %v301_v31  ;;  %v359_v48 = vmul.f32 %v327_v36, %v302_v32  ;;  %v360_v49 = vmul.f32 %v331_v37, %v295_v21  ;;  %v361_v50 = vmul.f32 %v335_v38, %v296_v22 }
  0x8a   : >> { %v362_v51 = vmul.f32 %v339_v39, %v297_v27  ;;  %v363_v52 = vmul.f32 %v343_v40, %v298_v28  ;;  %v364_v53 = vmul.f32 %v331_v37, %v299_v29  ;;  %v365_v54 = vmul.f32 %v335_v38, %v300_v30 }
  0x8b   : >> { %v366_v55 = vmul.f32 %v339_v39, %v301_v31  ;;  %v367_v56 = vmul.f32 %v343_v40, %v302_v32  ;;  %v368_v57 = vadd.f32 %v1165_v1, %v352_v41   ;;  %v369_v58 = vadd.f32 %v1161_v2, %v353_v42  }
  0x8c   : >> { %v370_v59 = vadd.f32 %v1157_v3, %v354_v43   ;;  %v1467_v4 = vadd.f32 %v1153_v4, %v355_v44   ;;  %v372_v61 = vadd.f32 %v1149_v5, %v356_v45   ;;  %v373_v62 = vadd.f32 %v1145_v6, %v357_v46  }
  0x8d   : >> { %v374_v63 = vadd.f32 %v1141_v7, %v358_v47   ;;  %v1469_v8 = vadd.f32 %v1137_v8, %v359_v48   ;;  %v376_v17 = vadd.f32 %v1133_v9, %v360_v49   ;;  %v377_v20 = vadd.f32 %v1129_v10, %v361_v50   ;;  %269 = sbr.rel (!%p1480_p4) target bundleno = 127 (0x7f), region = 103  ;;  %384 = vst [vmem:[#allocation2] sm:$0xff] (%p1480_p4), %v368_v57 }
  0x8e   : >> { %v1585_v60 = vmov %v1467_v4  ;;  %v378_v21 = vadd.f32 %v1125_v11, %v362_v51   ;;  %v379_v22 = vadd.f32 %v1121_v12, %v363_v52   ;;  %v380_v23 = vadd.f32 %v1117_v13, %v364_v53   ;;  %385 = vst [vmem:[#allocation2 + $0x8] sm:$0xff] (%p1480_p4), %v369_v58  ;;  %386 = vst [vmem:[#allocation2 + $0x10] sm:$0xff] (%p1480_p4), %v370_v59 }
  0x8f   : >> { %v1586_v0 = vmov %v1469_v8  ;;  %v381_v24 = vadd.f32 %v1113_v14, %v365_v54   ;;  %v382_v25 = vadd.f32 %v1109_v15, %v366_v55   ;;  %v383_v26 = vadd.f32 %v1105_v16, %v367_v56   ;;  %387 = vst [vmem:[#allocation2 + $0x18] sm:$0xff] (%p1480_p4), %v1585_v60  ;;  %388 = vst [vmem:[#allocation2 + $0x20] sm:$0x3] (%p1480_p4), %v372_v61 }
  0x90   : >> { %v1591_v13 = vmov %v380_v23  ;;  %v1592_v12 = vmov %v379_v22  ;;  %v1593_v11 = vmov %v378_v21  ;;  %v1594_v10 = vmov %v377_v20  ;;  %389 = vst [vmem:[#allocation2 + $0x28] sm:$0x3] (%p1480_p4), %v373_v62  ;;  %390 = vst [vmem:[#allocation2 + $0x30] sm:$0x3] (%p1480_p4), %v374_v63 }
  0x91   : >> { %v1588_v16 = vmov %v383_v26  ;;  %v1589_v15 = vmov %v382_v25  ;;  %v1590_v14 = vmov %v381_v24  ;;  %v1595_v9 = vmov %v376_v17  ;;  %391 = vst [vmem:[#allocation2 + $0x38] sm:$0x3] (%p1480_p4), %v1586_v0  ;;  %392 = vst [vmem:[#allocation2 + $0x40] sm:$0xff] (%p1480_p4), %v376_v17 }
  0x92   : >> { %v1596_v8 = vmov %v1586_v0  ;;  %v1597_v7 = vmov %v374_v63  ;;  %v1598_v6 = vmov %v373_v62  ;;  %v1599_v5 = vmov %v372_v61  ;;  %393 = vst [vmem:[#allocation2 + $0x48] sm:$0xff] (%p1480_p4), %v377_v20  ;;  %394 = vst [vmem:[#allocation2 + $0x50] sm:$0xff] (%p1480_p4), %v378_v21 }
  0x93   : >> { %v1600_v4 = vmov %v1585_v60  ;;  %v1601_v3 = vmov %v370_v59  ;;  %v1602_v2 = vmov %v369_v58  ;;  %v1603_v1 = vmov %v368_v57  ;;  %395 = vst [vmem:[#allocation2 + $0x58] sm:$0xff] (%p1480_p4), %v379_v22  ;;  %396 = vst [vmem:[#allocation2 + $0x60] sm:$0x3] (%p1480_p4), %v380_v23 }
  0x94   : > { %397 = vst [vmem:[#allocation2 + $0x68] sm:$0x3] %v381_v24  ;;  %398 = vst [vmem:[#allocation2 + $0x70] sm:$0x3] %v382_v25  ;;  %403 = sbr.rel (%p660_p8) target bundleno = 447 (0x1bf), region = 59  ;;  %v419_v1 = vadd.f32 (!%p660_p8), %v377_v20, %v376_v17  ;;  %v404_v2 = vadd.f32 (!%p660_p8), %v369_v58, %v368_v57  ;;  %vm409_vm0 = vcmask (!%p660_p8), 1041408  }
  0x95   : > { %399 = vst [vmem:[#allocation2 + $0x78] sm:$0x3] %v383_v26  ;;  %v424_v3 = vsel (!%p660_p8), %vm409_vm0, %v380_v23, 0.0  ;;  %v425_v4 = vsel (!%p660_p8), %vm409_vm0, %v381_v24, 0.0  ;;  %v427_v5 = vsel (!%p660_p8), %vm409_vm0, %v382_v25, 0.0  ;;  %v410_v9 = vsel (!%p660_p8), %vm409_vm0, %v372_v61, 0.0 }
  0x96   : > { %v420_v6 = vadd.f32 (!%p660_p8), %v419_v1, %v378_v21  ;;  %v405_v7 = vadd.f32 (!%p660_p8), %v404_v2, %v370_v59  ;;  %v426_v8 = vadd.f32 (!%p660_p8), %v425_v4, %v424_v3  ;;  %v429_v10 = vsel (!%p660_p8), %vm409_vm0, %v383_v26, 0.0  ;;  %v661_v31 = vld [vmem:[#allocation8] ss:$0 sm:$0xff] (!%p660_p8) }
  0x97   : > { %v411_v11 = vsel (!%p660_p8), %vm409_vm0, %v373_v62, 0.0  ;;  %v413_v12 = vsel (!%p660_p8), %vm409_vm0, %v374_v63, 0.0  ;;  %v415_v27 = vsel (!%p660_p8), %vm409_vm0, %v1586_v0, 0.0  ;;  %v1178_v32 = vmov (!%p660_p8), 0  }
  0x98   : > { %v421_v13 = vadd.f32 (!%p660_p8), %v420_v6, %v379_v22  ;;  %v406_v14 = vadd.f32 (!%p660_p8), %v405_v7, %v1585_v60  ;;  %v428_v15 = vadd.f32 (!%p660_p8), %v427_v5, %v426_v8  ;;  %v412_v16 = vadd.f32 (!%p660_p8), %v411_v11, %v410_v9  ;;  %872 = vset.pattern.permute.xlu0 (!%p660_p8), %v1178_v32 }
  0x99   : > { %871 = vset.pattern.permute.xlu1 (!%p660_p8), %v1178_v32  ;;  %v469_v43 = vand.u32 (!%p660_p8), 127, %v312_v18  ;;  %vm479_vm1 = vcmask (!%p660_p8), 130112   ;;  %vm490_vm2 = vcmask (!%p660_p8), 1041409   ;;  %vm493_vm3 = vcmask (!%p660_p8), 74752  }
  0x9a   : > { %422 = vadd.xlane.f32.xlu1 (!%p660_p8), %v421_v13  ;;  %407 = vadd.xlane.f32.xlu0 (!%p660_p8), %v406_v14  ;;  %v430_v28 = vadd.f32 (!%p660_p8), %v429_v10, %v428_v15  ;;  %v414_v29 = vadd.f32 (!%p660_p8), %v413_v12, %v412_v16 }
  0x9b   : > { %v474_v44 = vadd.s32 4294967288, %v469_v43  ;;  %v472_v48 = vsub.s32 %v469_v43, %v1461_v19 }
  0x9c   : > { %v416_v30 = vadd.f32 %v415_v27, %v414_v29 }
  0x9d   : > { %v477_v46 = vsub.s32 %v474_v44, %v1461_v19 }
  0x9e   : > { %431 = vadd.xlane.f32.xlu1 %v430_v28  ;;  %417 = vadd.xlane.f32.xlu0 %v416_v30 }
  0xaf   : > { %444 = vbcast.lane.b32.xlu1 %v661_v31, 264 }
  0xb4   : > { %440 = vbcast.lane.b32.xlu0 %v661_v31, 256 }
 0x127   : > { %v423_v33 = vpop.xlane.xlu1 %422  ;;  %v408_v34 = vpop.xlane.xlu0 %407 }
 0x12b   : > { %v432_v35 = vpop.xlane.xlu1 %431  ;;  %v418_v36 = vpop.xlane.xlu0 %417 }
 0x12f   : > { %v441_v37 = vpop.permute.xlu0 %440  ;;  %v445_v40 = vpop.permute.xlu1 %444 }
 0x130   : > { %v448_v38 = vadd.f32 %v441_v37, %v408_v34  ;;  %v450_v39 = vadd.f32 %v441_v37, %v423_v33  ;;  %v449_v41 = vadd.f32 %v445_v40, %v418_v36  ;;  %v451_v42 = vadd.f32 %v445_v40, %v432_v35 }
 0x132   : > { %463 = vperm.xlu0 %872, %v450_v39   ;;  %457 = vperm.xlu1 %871, %v448_v38  }
 0x136   : > { %460 = vperm.xlu1 %871, %v449_v41  }
 0x13a   : > { %466 = vperm.xlu1 %871, %v451_v42  }
 0x1b1   : > { %v458_v45 = vpop.permute.xlu1 %457  ;;  %v464_v49 = vpop.permute.xlu0 %463 }
 0x1b2   : > { %v484_v52 = vrot.slane %v464_v49, %v472_v48  ;;  %v473_v53 = vrot.slane %v458_v45, %v472_v48 }
 0x1b5   : > { %v461_v47 = vpop.permute.xlu1 %460 }
 0x1b6   : > { %v478_v50 = vrot.slane %v461_v47, %v477_v46 }
 0x1b8   : > { %v480_v55 = vsel %vm479_vm1, %v478_v50, %v473_v53 }
 0x1b9   : > { %v467_v51 = vpop.permute.xlu1 %466 }
 0x1ba   : > { %v488_v54 = vrot.slane %v467_v51, %v477_v46 }
 0x1bc   : > { %v489_v56 = vsel %vm479_vm1, %v488_v54, %v484_v52 }
 0x1bd   : > { %v491_v57 = vsel %vm490_vm2, %v489_v56, %v480_v55 }
 0x1be   : > { %494 = vst.msk [vmem:[#allocation9] sm:$0x3] %vm493_vm3, %v491_v57 }
 0x1bf PF: > { %p694_p12 = scmp.eq.s32.totalorder %s1219_s16, 2  ;;  %s1179_s6 = smov [#allocation9]  }
 0x1c0   : > { %s502_s11 = sshll.u32 %s1179_s6, 4  ;;  %s503_s11 = int_to_ptr.vmem [resolvable:$true] %s502_s11 }
 0x1c1   : > { %s961_s12 = scalar_lea.vmem %s503_s11, 32  ;;  %p968_p2 = scmp.lt.s32.totalorder %s503_s11, %s503_s11 }
 0x1c2   : > { %p962_p0 = scmp.ne.s32.totalorder %s503_s11, %s961_s12  ;;  %p969_p6 = scmp.lt.s32.totalorder %s961_s12, %s961_s12 }
 0x1c4   : > { %p963_p1 = pnand %p962_p0, %p694_p12  ;;  %p970_p9 = por %p969_p6, %p968_p2 }
 0x1c6   : > { %p964_p13 = pneg %p963_p1 }
 0x1c8   : > { %p971_p11 = pnand %p970_p9, %p964_p13 }
 0x1ca   : > { %974 = shalt.err (!%p971_p11)
}
 0x1cb   : > { %s975_s23 = scalar_lea.hbm %s1569_s3, 32 }
 0x1cc   : > { %p976_p5 = scmp.ne.s32.totalorder %s1569_s3, %s975_s23  ;;  %p981_p3 = scmp.lt.u32.totalorder %s975_s23, %s1569_s3 }
 0x1ce   : > { %p977_p7 = pnand %p976_p5, %p694_p12 }
 0x1d0   : > { %p978_p10 = pneg %p977_p7 }
 0x1d2   : > { %p983_p4 = pnand %p981_p3, %p978_p10 }
 0x1d4   : > { %986 = shalt.err (!%p983_p4)
}
 0x1d5   : > { %677 = dma.vmem_to_hbm [thread:$0]  (%p694_p12), %s503_s11, 32, %s1569_s3, [#allocation5]  }
 0x1d6   : > { %1084 = dma.done.wait (%p694_p12), [#allocation5], 32  }
 0x1d7   : > { %1086 = vsyncadd (%p694_p12), [#allocation5], 4294967264 }
 0x1d8 PF: > { %p17_p8 = scmp.ge.s32.totalorder %s1222_s17, 5   ;;  %s1604_s12 = smov %s1093_s13 }
 0x1d9   : > { %s1605_s13 = smov %s1097_s14  ;;  %s1606_s14 = smov %s1232_s20 }
 0x1da   : > { %s1607_s15 = smov %s1222_s17  ;;  %19 = sbr.rel (!%p17_p8) target bundleno = 6 (0x6), region = 114 }
 0x1e1   :  { %515 = vsyncpa [#allocation4], 1 }
 0x1e2   :  { %517 = vsyncpa [#allocation4 + $0x1], 1 }
 0x1e3   :  { %518 = vsyncpa [#allocation7], 1 }
 0x1e4   :  { %520 = vsyncpa [#allocation7 + $0x1], 1 }
 0x1e5   :  { %521 = vsyncpa [#allocation5], 1 }
 0x1e6   :  { %523 = vsyncpa [#allocation5 + $0x1], 1 }

</bundles_post_ra>
